<compile_context>
chip_gen: v5e
topology: v5e:2x2
jax: 0.10.0
libtpu: 0.0.40
codegen_flags: <defaults>
</compile_context>

<pallas_src>
import functools

import jax
import jax.numpy as jnp
from jax import lax
from jax.experimental import pallas as pl
from jax.experimental.pallas import tpu as pltpu

_LANE = 128
_SUB = 8

# Default batch-tile cap.  With the transposed dataflow per-row VMEM is
# ~1.5-2 KiB (x block lane-padded + lane-dense intermediates + double
# buffering), so 8192 rows ~ 12-16 MiB/step: fits v7x (64 MiB/TC) with
# headroom and v5e/v6e once the scoped-VMEM limit is raised.  Sweep via tb=.
_TB_CAP = 8192

# Above the 16/32 MiB scoped defaults, below v7x's 64 MiB physical VMEM/TC.
_VMEM_LIMIT_BYTES = 48 * 1024 * 1024


def _round_up(n, m):
    return ((n + m - 1) // m) * m


def _qnetwork_kernel(x_ref, p_ref, ot_ref, *, dims, offs):
    """Fused 3-layer MLP forward on one batch tile (transposed dataflow).

    x_ref: (TB, S) f32    p_ref: (P, 128) f32 packed params
    ot_ref: (A, TB) f32   (output transposed: batch on lanes)
    """
    S, H1, H2, A = dims
    o_w1, o_b1, o_w2, o_b2, o_w3, o_b3 = offs

    # Static, 8-row-aligned Ref slices (no full-block load / re-materialize).
    w1 = p_ref[o_w1:o_w1 + S, :H1]        # (S,  H1)
    b1 = p_ref[o_b1:o_b1 + H1, :1]        # (H1, 1)   bias stored transposed
    w2 = p_ref[o_w2:o_w2 + H1, :H2]       # (H1, H2)
    b2 = p_ref[o_b2:o_b2 + H2, :1]        # (H2, 1)
    w3 = p_ref[o_w3:o_w3 + H2, :A]        # (H2, A)
    b3 = p_ref[o_b3:o_b3 + A, :1]         # (A,  1)

    x = x_ref[...]                         # (TB, S)

    # h1^T = w1^T @ x^T : contract S (lhs dim0, rhs dim1) -> (H1, TB).
    dn_t = (((0,), (1,)), ((), ()))
    dn_0 = (((0,), (0,)), ((), ()))
    h1t = lax.dot_general(w1, x, dn_t, preferred_element_type=jnp.float32)
    h1t = jnp.maximum(h1t + b1, 0.0)                       # (H1, TB)

    h2t = lax.dot_general(w2, h1t, dn_0, preferred_element_type=jnp.float32)
    h2t = jnp.maximum(h2t + b2, 0.0)                       # (H2, TB)

    ot = lax.dot_general(w3, h2t, dn_0, preferred_element_type=jnp.float32)
    ot_ref[...] = (ot + b3).astype(ot_ref.dtype)           # (A, TB) lane-dense


def pack_qnetwork_params(params):
    """Pack w1,b1,w2,b2,w3,b3 into one (P, 128) f32 buffer.

    Each segment starts on an 8-row (sublane) boundary so in-kernel static
    Ref slices are tile-aligned.  Biases are packed transposed as (H, 1)
    columns.  Call ONCE per parameter update (outside the jitted forward).

    Returns (packed, dims, offsets) with dims/offsets as static tuples.
    """
    S, H1 = params["w1"].shape
    H2 = params["w2"].shape[1]
    A = params["w3"].shape[1]
    for name, fan_out in (("w1", H1), ("w2", H2), ("w3", A)):
        assert fan_out <= _LANE, (
            f"{name}: out_features={fan_out} > {_LANE}; packed layout would "
            f"silently clip weight columns")

    segs = [
        params["w1"].astype(jnp.float32),                 # (S,  H1)
        params["b1"].reshape(H1, 1).astype(jnp.float32),  # (H1, 1)
        params["w2"].astype(jnp.float32),                 # (H1, H2)
        params["b2"].reshape(H2, 1).astype(jnp.float32),  # (H2, 1)
        params["w3"].astype(jnp.float32),                 # (H2, A)
        params["b3"].reshape(A, 1).astype(jnp.float32),   # (A,  1)
    ]
    offs, rows = [], 0
    for s in segs:
        offs.append(rows)
        rows += _round_up(s.shape[0], _SUB)
    total_rows = _round_up(rows, _SUB)

    packed = jnp.zeros((total_rows, _LANE), jnp.float32)
    for off, s in zip(offs, segs):
        packed = packed.at[off:off + s.shape[0], :s.shape[1]].set(s)
    return packed, (S, H1, H2, A), tuple(offs)


@functools.partial(jax.jit, static_argnames=("dims", "offs", "tb"))
def qnetwork_forward(x, packed, *, dims, offs, tb=None):
    """Fused QNetwork forward pass via a single pallas_call.

    x: (batch, state_size) f32.  packed/dims/offs from pack_qnetwork_params.
    tb: batch-tile rows (sweepable; multiple of 128 recommended).
    Returns (batch, action_size) f32.
    """
    S, H1, H2, A = dims
    B = x.shape[0]
    assert x.shape[1] == S

    if tb is None:
        if B <= _TB_CAP:
            tb = B                                   # one full (exact) block
            if B >= 2048:
                # Keep >= 2 grid steps so v7x's two TCs both get work.
                tb = _round_up(pl.cdiv(B, 2), _LANE)
        else:
            tb = _TB_CAP

    grid = (pl.cdiv(B, tb),)
    kernel = functools.partial(_qnetwork_kernel, dims=dims, offs=offs)

    out_t = pl.pallas_call(
        kernel,
        out_shape=jax.ShapeDtypeStruct((A, B), jnp.float32),
        grid=grid,
        in_specs=[
            # batch-tiled activations; final block may be partial (no pad).
            pl.BlockSpec((tb, S), lambda i: (i, 0)),
            # packed params: full block, constant index_map -> stays resident.
            pl.BlockSpec(packed.shape, lambda i: (0, 0)),
        ],
        # Transposed output: batch on the lane axis -> unmasked full-width
        # stores; OOB lanes of a partial final block are masked by Pallas.
        out_specs=pl.BlockSpec((A, tb), lambda i: (0, i)),
        compiler_params=pltpu.CompilerParams(
            dimension_semantics=("parallel",),
            vmem_limit_bytes=_VMEM_LIMIT_BYTES),
    )(x, packed)

    return out_t.T   # (B, A); tiny transpose in the wrapper


def init_qnetwork_params(key, state_size, action_size,
                         n_hidden_units=(64, 16)):
    """Deterministic init mirroring nn.Linear's default U(-1/sqrt(fan_in), ..)."""
    dims = [state_size, *n_hidden_units, action_size]
    params = {}
    for i in range(len(dims) - 1):
        fan_in, fan_out = dims[i], dims[i + 1]
        key, kw, kb = jax.random.split(key, 3)
        bound = 1.0 / jnp.sqrt(jnp.float32(fan_in))
        # stored transposed relative to PyTorch: (in_features, out_features)
        params[f"w{i+1}"] = jax.random.uniform(
            kw, (fan_in, fan_out), jnp.float32, -bound, bound)
        params[f"b{i+1}"] = jax.random.uniform(
            kb, (1, fan_out), jnp.float32, -bound, bound)
    return params


def qnetwork_reference(x, params):
    """Plain-JAX reference for correctness checking."""
    h = jnp.maximum(x @ params["w1"] + params["b1"], 0.0)
    h = jnp.maximum(h @ params["w2"] + params["b2"], 0.0)
    return h @ params["w3"] + params["b3"]


if __name__ == "__main__":
    key = jax.random.PRNGKey(0)
    kx, kp = jax.random.split(key)

    batch = 8
    state_size = 8
    action_size = 4
    n_hidden_units = (64, 16)

    params = init_qnetwork_params(kp, state_size, action_size, n_hidden_units)
    # Pack ONCE (outside the jitted forward); reuse across forward calls.
    packed, dims, offs = pack_qnetwork_params(params)

    # 1) Tiny batch, single exact block.
    x = jax.random.normal(kx, (batch, state_size), jnp.float32)
    out = jax.block_until_ready(qnetwork_forward(x, packed, dims=dims, offs=offs))
    ref = qnetwork_reference(x, params)
    assert out.shape == (batch, action_size)
    assert jnp.allclose(out, ref, atol=1e-5, rtol=1e-5), "mismatch vs reference"

    # 2) Non-divisible batch, forced small tile -> multi-step grid with a
    #    partial final block (no wrapper-side padding).
    x_big = jax.random.normal(kx, (1000, state_size), jnp.float32)
    out_big = jax.block_until_ready(
        qnetwork_forward(x_big, packed, dims=dims, offs=offs, tb=256))
    ref_big = qnetwork_reference(x_big, params)
    assert out_big.shape == (1000, action_size)
    assert jnp.allclose(out_big, ref_big, atol=1e-5, rtol=1e-5), "big-batch mismatch"

    # 3) Larger batch on the default tile policy (splits into >= 2 steps).
    x_huge = jax.random.normal(kx, (4096, state_size), jnp.float32)
    out_huge = jax.block_until_ready(
        qnetwork_forward(x_huge, packed, dims=dims, offs=offs))
    ref_huge = qnetwork_reference(x_huge, params)
    assert out_huge.shape == (4096, action_size)
    assert jnp.allclose(out_huge, ref_huge, atol=1e-5, rtol=1e-5), "huge-batch mismatch"

    print("KERNEL_OK")
</pallas_src>

<mosaic_0001>
module attributes {stable_mosaic.version = 11 : i64} {
  func.func @_qnetwork_kernel(%arg0: i32, %arg1: memref<8x8xf32, #tpu.memory_space<vmem>>, %arg2: memref<176x128xf32, #tpu.memory_space<vmem>>, %arg3: memref<4x8xf32, #tpu.memory_space<vmem>>) attributes {dimension_semantics = [#tpu.dimension_semantics<parallel>], iteration_bounds = array<i64: 1>, scalar_prefetch = 0 : i64, scratch_operands = 0 : i64, tpu.core_type = #tpu.core_type<tc>, window_params = [{transform_indices = @transform_0, window_bounds = array<i64: 8, 8>}, {pipeline_mode = #tpu.pipeline_mode<synchronous>, transform_indices = @transform_1, window_bounds = array<i64: 176, 128>}, {transform_indices = @transform_2, window_bounds = array<i64: 4, 8>}]} {
    %c0 = arith.constant 0 : index
    %c0_0 = arith.constant 0 : index
    %0 = vector.load %arg2[%c0, %c0_0] : memref<176x128xf32, #tpu.memory_space<vmem>>, vector<8x64xf32>
    %c8 = arith.constant 8 : index
    %c0_1 = arith.constant 0 : index
    %1 = vector.load %arg2[%c8, %c0_1] : memref<176x128xf32, #tpu.memory_space<vmem>>, vector<64x1xf32>
    %c72 = arith.constant 72 : index
    %c0_2 = arith.constant 0 : index
    %2 = vector.load %arg2[%c72, %c0_2] : memref<176x128xf32, #tpu.memory_space<vmem>>, vector<64x16xf32>
    %c136 = arith.constant 136 : index
    %c0_3 = arith.constant 0 : index
    %3 = vector.load %arg2[%c136, %c0_3] : memref<176x128xf32, #tpu.memory_space<vmem>>, vector<16x1xf32>
    %c152 = arith.constant 152 : index
    %c0_4 = arith.constant 0 : index
    %4 = vector.load %arg2[%c152, %c0_4] : memref<176x128xf32, #tpu.memory_space<vmem>>, vector<16x4xf32>
    %c168 = arith.constant 168 : index
    %c0_5 = arith.constant 0 : index
    %5 = vector.load %arg2[%c168, %c0_5] : memref<176x128xf32, #tpu.memory_space<vmem>>, vector<4x1xf32>
    %c0_6 = arith.constant 0 : index
    %c0_7 = arith.constant 0 : index
    %6 = vector.load %arg1[%c0_6, %c0_7] : memref<8x8xf32, #tpu.memory_space<vmem>>, vector<8x8xf32>
    %cst = arith.constant dense<0.000000e+00> : vector<64x8xf32>
    %7 = tpu.matmul %0, %6, %cst {dimension_numbers = #tpu.dot_dimension_numbers<[0], [1], [1], [0], [0, 1, 1, 0], [], []>} : vector<8x64xf32>, vector<8x8xf32>, vector<64x8xf32> -> vector<64x8xf32>
    %8 = vector.broadcast %1 : vector<64x1xf32> to vector<64x8xf32>
    %9 = arith.addf %7, %8 : vector<64x8xf32>
    %cst_8 = arith.constant 0.000000e+00 : f32
    %10 = vector.broadcast %cst_8 : f32 to vector<64x8xf32>
    %11 = arith.maximumf %9, %10 : vector<64x8xf32>
    %cst_9 = arith.constant dense<0.000000e+00> : vector<16x8xf32>
    %12 = tpu.matmul %2, %11, %cst_9 {dimension_numbers = #tpu.dot_dimension_numbers<[0], [0], [1], [1], [0, 1, 1, 1], [], []>} : vector<64x16xf32>, vector<64x8xf32>, vector<16x8xf32> -> vector<16x8xf32>
    %13 = vector.broadcast %3 : vector<16x1xf32> to vector<16x8xf32>
    %14 = arith.addf %12, %13 : vector<16x8xf32>
    %cst_10 = arith.constant 0.000000e+00 : f32
    %15 = vector.broadcast %cst_10 : f32 to vector<16x8xf32>
    %16 = arith.maximumf %14, %15 : vector<16x8xf32>
    %cst_11 = arith.constant dense<0.000000e+00> : vector<4x8xf32>
    %17 = tpu.matmul %4, %16, %cst_11 {dimension_numbers = #tpu.dot_dimension_numbers<[0], [0], [1], [1], [0, 1, 1, 1], [], []>} : vector<16x4xf32>, vector<16x8xf32>, vector<4x8xf32> -> vector<4x8xf32>
    %18 = vector.broadcast %5 : vector<4x1xf32> to vector<4x8xf32>
    %19 = arith.addf %17, %18 : vector<4x8xf32>
    %c0_12 = arith.constant 0 : index
    %c0_13 = arith.constant 0 : index
    %20 = vector.load %arg3[%c0_12, %c0_13] : memref<4x8xf32, #tpu.memory_space<vmem>>, vector<4x8xf32>
    tpu.vector_store %arg3[%c0_12, %c0_13], %19 {strides = array<i32>} : memref<4x8xf32, #tpu.memory_space<vmem>>, vector<4x8xf32>,
    return
  }
  func.func @transform_0(%arg0: i32) -> (i32, i32) {
    %c0_i32 = arith.constant 0 : i32
    %c0_i32_0 = arith.constant 0 : i32
    return %arg0, %c0_i32 : i32, i32
  }
  func.func @transform_1(%arg0: i32) -> (i32, i32) {
    %c0_i32 = arith.constant 0 : i32
    %c0_i32_0 = arith.constant 0 : i32
    %c0_i32_1 = arith.constant 0 : i32
    return %c0_i32, %c0_i32_0 : i32, i32
  }
  func.func @transform_2(%arg0: i32) -> (i32, i32) {
    %c0_i32 = arith.constant 0 : i32
    %c0_i32_0 = arith.constant 0 : i32
    return %c0_i32, %arg0 : i32, i32
  }
}

</mosaic_0001>

<bundles_post_ra>
// kernel: qnetwork_forward.1
= control target key start
LH: loop header
LB: loop body
LE: loop exit
PB: predicated region body
PF: predicated region fallthrough
CT: control target
= control target key end

     0   :  { %7 = vsyncpa [#allocation3], 0  ;;  %s510_s0 = inlined_call_operand.hbm [shape: f32[8,8], index: 0, kind: input, shape index: {}]   ;;  %s511_s1 = inlined_call_operand.hbm [shape: f32[176,128], index: 1, kind: input, shape index: {}]   ;;  %s512_s2 = inlined_call_operand.hbm [shape: f32[4,8], index: 2, kind: output, shape index: {}]  }
   0x1   :  { %8 = vsyncpa [#allocation6], 0 }
   0x2   :  { %9 = vsyncpa [#allocation4], 0  ;;  %s15_s11 = sshll.u32 %s510_s0, 4  ;;  %s470_s12 = smov [#allocation2]   ;;  %s16_s11 = int_to_ptr.hbm [resolvable:$true] %s15_s11 }
   0x3   :  { %s17_s13 = sshll.u32 %s470_s12, 4  ;;  %s25_s16 = sshll.u32 %s511_s1, 4  ;;  %s18_s13 = int_to_ptr.vmem [resolvable:$true] %s17_s13  ;;  %s26_s16 = int_to_ptr.hbm [resolvable:$true] %s25_s16 }
   0x4   :  { %20 = dma.hbm_to_vmem [thread:$0]  %s16_s11, 128, %s18_s13, [#allocation3]  }
   0x5   :  { %s471_s17 = smov [#allocation5]   ;;  %s472_s19 = smov 128  }
   0x6   :  { %s27_s18 = sshll.u32 %s471_s17, 4  ;;  %s473_s20 = smov 8   ;;  %s28_s18 = int_to_ptr.vmem [resolvable:$true] %s27_s18 }
   0x7   :  { %33 = dma.hbm_to_vmem [thread:$0]  %s26_s16, 2816, %s28_s18, [#allocation6], %s472_s19, %s472_s19, %s473_s20  }
   0x8   :  { %464 = dma.done.wait [#allocation3], 128  }
   0x9   :  { %465 = vsyncadd [#allocation3], 4294967168 }
   0xa   :  { %466 = dma.done.wait [#allocation6], 2816  }
   0xb   :  { %467 = vsyncadd [#allocation6], 4294964480  ;;  %v474_v0 = vmov 0   ;;  %v42_v1 = vld [vmem:[#allocation5] sm:$0xff]  ;;  %v49_v2 = vld [vmem:[#allocation5 + $0x38] sm:$0xff]  ;;  %vm137_vm0 = vcmask 64512  }
   0xc   :  { %390 = vset.pattern.permute.xlu1 %v474_v0  ;;  %391 = vset.pattern.permute.xlu2 %v474_v0  ;;  %v48_v3 = vld [vmem:[#allocation5 + $0x30] sm:$0xff]  ;;  %v45_v4 = vld [vmem:[#allocation5 + $0x18] sm:$0xff]  ;;  %v43_v5 = vld [vmem:[#allocation5 + $0x8] sm:$0xff]  ;;  %vm256_vm1 = vcmask 523264   ;;  %vm325_vm2 = vcmask 130048   ;;  %s475_s0 = smov [#allocation7]  }
   0xd   :  { %105 = vxpose.xlu0.b32.start.end [1/1] (short) (narrow) %v42_v1, 64  ;;  %97 = vperm.xlu1 %390, %v49_v2   ;;  %v60_v6 = vld [vmem:[#allocation5 + $0x90] sm:$0xff]  ;;  %v59_v7 = vld [vmem:[#allocation5 + $0x88] sm:$0xff]  ;;  %v64_v9 = vld [vmem:[#allocation2] sm:$0xff]  ;;  %s356_s1 = sshll.u32 %s475_s0, 4  ;;  %s358_s23 = sshll.u32 %s512_s2, 4  ;;  %s357_s1 = int_to_ptr.vmem [resolvable:$true] %s356_s1  ;;  %s359_s23 = int_to_ptr.hbm [resolvable:$true] %s358_s23 }
   0xe   :  { %v47_v8 = vld [vmem:[#allocation5 + $0x28] sm:$0xff]  ;;  %369 = vmatpush.xpose.msk.msra.mxu0 %vm137_vm0, %v64_v9  ;;  %381 = vmatpush.xpose.msk.msra.mxu3 %vm137_vm0, %v64_v9  ;;  %v46_v10 = vld [vmem:[#allocation5 + $0x20] sm:$0xff]  ;;  %v44_v11 = vld [vmem:[#allocation5 + $0x10] sm:$0xff]  ;;  %vm349_vm3 = vcmask 60416  }
   0xf   :  { %87 = vperm.xlu2 %391, %v47_v8   ;;  %v61_v12 = vld [vmem:[#allocation5 + $0x98] sm:$0xff]  ;;  %v62_v13 = vld [vmem:[#allocation5 + $0xa0] sm:$0xff]  ;;  %v51_v17 = vld [vmem:[#allocation5 + $0x48] sm:$0xff] }
  0x10   :  { %v52_v19 = vld [vmem:[#allocation5 + $0x50] sm:$0xff]  ;;  %v63_v20 = vld [vmem:[#allocation5 + $0xa8] sm:$0xf]  ;;  %v50_v21 = vld [vmem:[#allocation5 + $0x40] sm:$0xff] }
  0x11   :  { %v53_v22 = vld [vmem:[#allocation5 + $0x58] sm:$0xff]  ;;  %v54_v24 = vld [vmem:[#allocation5 + $0x60] sm:$0xff]  ;;  %v55_v26 = vld [vmem:[#allocation5 + $0x68] sm:$0xff] }
  0x12   :  { %v56_v28 = vld [vmem:[#allocation5 + $0x70] sm:$0xff]  ;;  %v57_v30 = vld [vmem:[#allocation5 + $0x78] sm:$0xff]  ;;  %v58_v31 = vld [vmem:[#allocation5 + $0x80] sm:$0xff] }
  0x15   :  { %92 = vperm.xlu1 %390, %v48_v3  }
  0x17   :  { %82 = vperm.xlu2 %391, %v46_v10  }
  0x1d   :  { %77 = vperm.xlu1 %390, %v45_v4  }
  0x1f   :  { %72 = vperm.xlu2 %391, %v44_v11  }
  0x25   :  { %67 = vperm.xlu1 %390, %v43_v5  }
  0x2d   :  { %221 = vperm.xlu1 %390, %v60_v6  }
  0x35   :  { %216 = vperm.xlu1 %390, %v59_v7  }
  0x45   :  { %224 = vxpose.xlu2.b32.start [1/8] (short) (narrow) %v51_v17, 16 }
  0x4d   :  { %225 = vxpose.xlu2.b32.cont [2/8] (short) (narrow) %v52_v19, 16 }
  0x55   :  { %226 = vxpose.xlu2.b32.cont [3/8] (short) (narrow) %v53_v22, 16 }
  0x5d   :  { %227 = vxpose.xlu2.b32.cont [4/8] (short) (narrow) %v54_v24, 16 }
  0x65   :  { %228 = vxpose.xlu2.b32.cont [5/8] (short) (narrow) %v55_v26, 16 }
  0x69   :  { %v88_v37 = vpop.permute.xlu2 %87 }
  0x6a   :  { %293 = vxpose.xlu1.b32.start [1/2] (short) (narrow) %v61_v12, 8 }
  0x6d   :  { %229 = vxpose.xlu2.b32.cont [6/8] (short) (narrow) %v56_v28, 16 }
  0x71   :  { %v83_v41 = vpop.permute.xlu2 %82 }
  0x72   :  { %294 = vxpose.xlu1.b32.end [2/2] (short) (narrow) %v62_v13, 8 }
  0x74   :  { %389 = vset.pattern.permute.xlu0 %v474_v0 }
  0x75   :  { %230 = vxpose.xlu2.b32.cont [7/8] (short) (narrow) %v57_v30, 16 }
  0x79   :  { %v73_v52 = vpop.permute.xlu2 %72 }
  0x7d   :  { %231 = vxpose.xlu2.b32.end [8/8] (short) (narrow) %v58_v31, 16 }
  0x7f   :  { %v98_v34 = vpop.permute.xlu1 %97 }
  0x87   :  { %v93_v38 = vpop.permute.xlu1 %92 }
  0x8f   :  { %v78_v43 = vpop.permute.xlu1 %77 }
  0x97   :  { %v68_v57 = vpop.permute.xlu1 %67 }
  0x9f   :  { %v222_v2 = vpop.permute.xlu1 %221 }
  0xa7   :  { %v217_v4 = vpop.permute.xlu1 %216 }
  0xb1   :  { %v121_v14 = vpop.trf.xlu0 }
  0xb2   :  { %370 = vmatmul.msk.f32.vlgmr.msra.gmra.mxu0 %vm137_vm0, %v121_v14 }
  0xb3   :  { %102 = vperm.xlu0 %389, %v50_v21  }
  0xb9   :  { %v122_v15 = vpop.trf.xlu0 }
  0xba   :  { %371 = vmatmul.msk.f32.gmra.mxu0 %vm137_vm0, %v122_v15 }
  0xc1   :  { %v123_v16 = vpop.trf.xlu0 }
  0xc2   :  { %372 = vmatmul.msk.f32.gmra.mxu0 %vm137_vm0, %v123_v16 }
  0xc9   :  { %v124_v18 = vpop.trf.xlu0 }
  0xca   :  { %373 = vmatmul.msk.f32.gmra.mxu0 %vm137_vm0, %v124_v18 }
  0xcc   :  { %290 = vperm.xlu1 %390, %v63_v20  }
  0xd1   :  { %v125_v23 = vpop.trf.xlu0 }
  0xd2   :  { %374 = vmatmul.msk.f32.vlgmr.msra.gmra.mxu3 %vm137_vm0, %v125_v23 }
  0xd9   :  { %v126_v25 = vpop.trf.xlu0 }
  0xda   :  { %375 = vmatmul.msk.f32.gmra.mxu3 %vm137_vm0, %v126_v25 }
  0xde   :  { %v240_v63 = vpop.trf.xlu2 }
  0xe1   :  { %v127_v27 = vpop.trf.xlu0 }
  0xe2   :  { %376 = vmatmul.msk.f32.gmra.mxu3 %vm137_vm0, %v127_v27 }
  0xe6   :  { %v241_v1 = vpop.trf.xlu2 }
  0xe9   :  { %v128_v29 = vpop.trf.xlu0 }
  0xea   :  { %377 = vmatmul.msk.f32.gmra.mxu3 %vm137_vm0, %v128_v29 }
 0x10e   :  { %v309_v10 = vpop.trf.xlu1 }
 0x125   :  { %v103_v42 = vpop.permute.xlu0 %102 }
 0x12f   :  { %v182_v32 = vpop.f32.mrf.mxu0 }
 0x130   :  { %v183_v60 = vadd.f32 %v182_v32, %v68_v57 }
 0x132   :  { %v206_v0 = vmax.f32 %v183_v60, 0.0 }
 0x137   :  { %v185_v35 = vpop.f32.mrf.mxu0 }
 0x138   :  { %v186_v58 = vadd.f32 %v185_v35, %v73_v52 }
 0x13a   :  { %v207_v62 = vmax.f32 %v186_v58, 0.0 }
 0x13e   :  { %v291_v11 = vpop.permute.xlu1 %290 }
 0x13f   :  { %v188_v40 = vpop.f32.mrf.mxu0 }
 0x140   :  { %v189_v55 = vadd.f32 %v188_v40, %v78_v43 }
 0x142   :  { %v208_v61 = vmax.f32 %v189_v55, 0.0 }
 0x147   :  { %v191_v49 = vpop.f32.mrf.mxu0 }
 0x148   :  { %v192_v53 = vadd.f32 %v191_v49, %v83_v41 }
 0x14a   :  { %v209_v59 = vmax.f32 %v192_v53, 0.0 }
 0x155   :  { %v194_v33 = vpop.f32.mrf.mxu3 }
 0x156   :  { %v195_v50 = vadd.f32 %v194_v33, %v88_v37 }
 0x158   :  { %v210_v56 = vmax.f32 %v195_v50, 0.0 }
 0x15d   :  { %v197_v36 = vpop.f32.mrf.mxu3 }
 0x15e   :  { %v198_v47 = vadd.f32 %v197_v36, %v93_v38 }
 0x160   :  { %v211_v54 = vmax.f32 %v198_v47, 0.0 }
 0x165   :  { %v200_v39 = vpop.f32.mrf.mxu3 }
 0x166   :  { %v201_v45 = vadd.f32 %v200_v39, %v98_v34 }
 0x168   :  { %v212_v51 = vmax.f32 %v201_v45, 0.0 }
 0x16d   :  { %v203_v44 = vpop.f32.mrf.mxu3 }
 0x16e   :  { %v204_v46 = vadd.f32 %v203_v44, %v103_v42 }
 0x170   :  { %v213_v48 = vmax.f32 %v204_v46, 0.0 }
 0x172   :  { %271 = vmatpush.msra.mxu1 %v213_v48 }
 0x174   :  { %272 = vmatpush.msra.mxu1 %v212_v51 }
 0x176   :  { %273 = vmatpush.msra.mxu1 %v211_v54 }
 0x178   :  { %274 = vmatpush.msra.mxu1 %v210_v56 }
 0x17a   :  { %275 = vmatpush.msra.mxu1 %v209_v59 }
 0x17c   :  { %276 = vmatpush.msra.mxu1 %v208_v61 }
 0x17e   :  { %277 = vmatpush.msra.mxu1 %v207_v62 }
 0x180   :  { %278 = vmatpush.msra.mxu1 %v206_v0 }
 0x181   :  { %378 = vmatmul.msk.f32.vlgmr.msra.gmra.mxu1 %vm256_vm1, %v240_v63 }
 0x189   :  { %379 = vmatmul.msk.f32.gmra.mxu1 %vm256_vm1, %v241_v1 }
 0x1fe   :  { %v280_v3 = vpop.f32.mrf.mxu1 }
 0x1ff   :  { %v281_v6 = vadd.f32 %v280_v3, %v217_v4 }
 0x201   :  { %v286_v9 = vmax.f32 %v281_v6, 0.0 }
 0x206   :  { %v283_v5 = vpop.f32.mrf.mxu1 }
 0x207   :  { %v284_v7 = vadd.f32 %v283_v5, %v222_v2 }
 0x209   :  { %v287_v8 = vmax.f32 %v284_v7, 0.0 }
 0x20b   :  { %343 = vmatpush.msra.mxu2 %v287_v8 }
 0x20d   :  { %344 = vmatpush.msra.mxu2 %v286_v9 }
 0x20e   :  { %380 = vmatmul.msk.f32.vlgmr.msra.gmra.mxu2 %vm325_vm2, %v309_v10 }
 0x291   :  { %v346_v12 = vpop.f32.mrf.mxu2 }
 0x292   :  { %v347_v13 = vadd.f32 %v346_v12, %v291_v11 }
 0x294   :  { %350 = vst.msk [vmem:[#allocation7] sm:$0xf] %vm349_vm3, %v347_v13 }
 0x295   :  { %361 = dma.vmem_to_hbm [thread:$0]  %s357_s1, 64, %s359_s23, [#allocation4]  }
 0x296   :  { %468 = dma.done.wait [#allocation4], 64  }
 0x297   :  { %469 = vsyncadd [#allocation4], 4294967232 }
 0x298   :  { %366 = vsyncpa [#allocation3], 1 }
 0x299   :  { %367 = vsyncpa [#allocation6], 1 }
 0x29a   :  { %368 = vsyncpa [#allocation4], 1 }

</bundles_post_ra>
